<compile_context>
chip_gen: v5e
topology: v5e:2x2
jax: 0.10.0
libtpu: 0.0.40
codegen_flags: <defaults>
</compile_context>

<pallas_src>
import functools

import jax
import jax.numpy as jnp
from jax import lax
from jax.experimental import pallas as pl
from jax.experimental.pallas import tpu as pltpu

_F32_BYTES = 4
_VMEM_BUDGET = 40 << 20      # working-set target: fits v7x (64 MiB physical) with headroom
_VMEM_LIMIT_CAP = 48 << 20   # scoped-VMEM limit we are willing to request on any generation


def _cdiv(a, b):
    return -(-a // b)


def _round_up(a, m):
    return _cdiv(a, m) * m


# --------------------------------------------------------------------------------------
# Kernels
# --------------------------------------------------------------------------------------
def value_network_kernel(x_ref, w1_ref, b1_ref, w2_ref, b2_ref, o_ref):
    """Whole-K kernel.  grid = (batch tiles,).

    x_ref : (TB, D)  native dtype     w1_ref: (D, H)  f32 (VMEM-resident, constant index)
    b1_ref: (1, H)   f32              w2_ref: (1, H)  f32 (second layer as a row)
    b2_ref: (1,)     f32 (SMEM)       o_ref : (TB, 1) f32
    """
    x = x_ref[...].astype(jnp.float32)        # in-kernel cast (VPU), hidden under DMA/MXU
    h = jnp.dot(x, w1_ref[...], preferred_element_type=jnp.float32)
    h = jnp.maximum(h + b1_ref[...], 0.0)
    # N=1 second matmul would waste the MXU; use VPU multiply + XLU lane reduce instead.
    v = jnp.sum(h * w2_ref[...], axis=-1, keepdims=True) + b2_ref[0]
    o_ref[...] = v.astype(o_ref.dtype)


def value_network_kernel_ktiled(d_total, x_ref, w1_ref, b1_ref, w2_ref, b2_ref, o_ref,
                                acc_ref):
    """K-tiled kernel for large flattened D.  grid = (batch tiles, K tiles), K last.

    x_ref : (TB, TK)   w1_ref: (TK, H)   acc_ref: (TB, H) f32 scratch accumulator.
    """
    k = pl.program_id(1)

    @pl.when(k == 0)
    def _():
        acc_ref[...] = jnp.zeros_like(acc_ref)

    x = x_ref[...].astype(jnp.float32)
    w = w1_ref[...]
    tb, tk = x.shape
    h_dim = w.shape[1]
    if d_total % tk != 0:   # static: only emit masking code when the K grid is ragged
        # The last K block reads past D; zero the out-of-range columns/rows so (possibly
        # non-finite) padding garbage cannot leak into the accumulator.
        valid = d_total - k * tk
        col = lax.broadcasted_iota(jnp.int32, (tb, tk), 1)
        x = jnp.where(col < valid, x, 0.0)
        row = lax.broadcasted_iota(jnp.int32, (tk, h_dim), 0)
        w = jnp.where(row < valid, w, 0.0)

    acc_ref[...] += jnp.dot(x, w, preferred_element_type=jnp.float32)

    @pl.when(k == pl.num_programs(1) - 1)
    def _():
        h = jnp.maximum(acc_ref[...] + b1_ref[...], 0.0)
        v = jnp.sum(h * w2_ref[...], axis=-1, keepdims=True) + b2_ref[0]
        o_ref[...] = v.astype(o_ref.dtype)


# --------------------------------------------------------------------------------------
# Tile planning / wrapper
# --------------------------------------------------------------------------------------
def _plan_tiles(batch, d, h, x_bytes):
    """Pick (TB, TK-or-None, grid_b, vmem_limit_bytes) from the VMEM footprint."""
    # ---- batch tile -------------------------------------------------------------------
    if batch <= 8:
        tb = batch                                   # single tile == full (tiny) batch dim
    else:
        row_bytes = max(d * x_bytes, 1)
        rows_4mib = (4 << 20) // row_bytes           # target ~2-4 MiB per x buffer
        tb_cap = min(1024, max(8, (rows_4mib // 8) * 8))
        n_tiles = max(2, _cdiv(batch, tb_cap))       # >=2 tiles: keep both v7x TCs busy
        if n_tiles % 2:
            n_tiles += 1                             # even tile count: balanced megacore split
        tb = min(_round_up(_cdiv(batch, n_tiles), 8), _round_up(batch, 8))
    grid_b = _cdiv(batch, tb)

    # ---- K tile -----------------------------------------------------------------------
    x_tile = tb * d * x_bytes
    w1_bytes = d * h * _F32_BYTES
    epilogue = tb * h * _F32_BYTES + 4 * h * _F32_BYTES + 2 * tb * _F32_BYTES
    # Conservative footprint: assume double buffering for everything (Buffered(1) on the
    # resident w1 then just becomes extra headroom).
    untiled = 2 * x_tile + 2 * w1_bytes + epilogue
    if untiled <= _VMEM_BUDGET:
        tk = None
        footprint = untiled
    else:
        # Stream w1 in (TK, H) blocks; the f32 (TB, H) accumulator lives in scratch.
        avail = max(_VMEM_BUDGET - epilogue, 1 << 20)
        tk = avail // (2 * (tb * x_bytes + h * _F32_BYTES))
        tk = max(128, min(_round_up(d, 128), (tk // 128) * 128))
        footprint = 2 * tb * tk * x_bytes + 2 * tk * h * _F32_BYTES + epilogue

    vmem_limit = int(min(_VMEM_LIMIT_CAP, max(32 << 20, (footprint * 3) // 2)))
    return tb, tk, grid_b, vmem_limit


def _spec(shape, index_map, buffers=None):
    """BlockSpec, optionally with an explicit buffer count (pl.Buffered).  Falls back to the
    default (double-buffered) spec if this JAX build does not accept pipeline_mode."""
    if buffers is not None:
        try:
            return pl.BlockSpec(shape, index_map, pipeline_mode=pl.Buffered(buffers))
        except Exception:
            pass
    return pl.BlockSpec(shape, index_map)


def value_network_forward(x, w1, b1, w2, b2, *, k_tile=None):
    """ValueNetwork forward.  x: (B, ...) float array.  Returns (B,) float32
    (== .squeeze(-1) of the (B, 1) linear output)."""
    B = x.shape[0]
    x_flat = x.reshape(B, -1)                        # nn.Flatten() -- metadata-only under jit
    D = x_flat.shape[1]
    H = w1.shape[1]

    w1_f = w1.astype(jnp.float32)
    b1_row = b1.reshape(1, H).astype(jnp.float32)
    w2_row = w2.reshape(1, H).astype(jnp.float32)    # (H, 1) second layer -> (1, H) row
    b2_vec = b2.reshape(1).astype(jnp.float32)

    x_bytes = x_flat.dtype.itemsize
    TB, TK, grid_b, vmem_limit = _plan_tiles(B, D, H, x_bytes)
    if k_tile is not None:                           # test/override hook for the K-tiled path
        TK = k_tile

    # Resident w1: single-buffer only when the saved copy is material (>= 4 MiB).
    w1_buffers = 1 if (TK is None and D * H * _F32_BYTES >= (4 << 20)) else None
    # Deep-buffer x only in the tiny-tile / many-step regime (hides per-step overhead).
    x_buffers = 3 if (TK is None and TB * D * x_bytes <= (1 << 20) and grid_b >= 8) else None

    out_shape = jax.ShapeDtypeStruct((B, 1), jnp.float32)
    smem_spec = pl.BlockSpec(memory_space=pltpu.MemorySpace.SMEM)

    if TK is None:
        out = pl.pallas_call(
            value_network_kernel,
            out_shape=out_shape,
            grid=(grid_b,),
            in_specs=[
                _spec((TB, D), lambda i: (i, 0), buffers=x_buffers),   # x: batch-tiled stream
                _spec((D, H), lambda i: (0, 0), buffers=w1_buffers),   # w1: VMEM-resident
                pl.BlockSpec((1, H), lambda i: (0, 0)),                # b1: VMEM-resident
                pl.BlockSpec((1, H), lambda i: (0, 0)),                # w2 row: VMEM-resident
                smem_spec,                                             # b2: scalar in SMEM
            ],
            out_specs=pl.BlockSpec((TB, 1), lambda i: (i, 0)),
            compiler_params=pltpu.CompilerParams(
                dimension_semantics=("parallel",),
                vmem_limit_bytes=vmem_limit,
            ),
        )(x_flat, w1_f, b1_row, w2_row, b2_vec)
    else:
        grid_k = _cdiv(D, TK)
        out = pl.pallas_call(
            functools.partial(value_network_kernel_ktiled, D),
            out_shape=out_shape,
            grid=(grid_b, grid_k),                                     # reduction axis last
            in_specs=[
                pl.BlockSpec((TB, TK), lambda i, k: (i, k)),           # x: (batch, K) tiles
                pl.BlockSpec((TK, H), lambda i, k: (k, 0)),            # w1: K-streamed
                pl.BlockSpec((1, H), lambda i, k: (0, 0)),
                pl.BlockSpec((1, H), lambda i, k: (0, 0)),
                smem_spec,
            ],
            out_specs=pl.BlockSpec((TB, 1), lambda i, k: (i, 0)),
            scratch_shapes=[pltpu.VMEM((TB, H), jnp.float32)],
            compiler_params=pltpu.CompilerParams(
                dimension_semantics=("parallel", "arbitrary"),
                vmem_limit_bytes=vmem_limit,
            ),
        )(x_flat, w1_f, b1_row, w2_row, b2_vec)

    return out[:, 0]                                                   # .squeeze(-1)


def init_params(key, input_dim, hidden_size=128):
    """Deterministic init mimicking nn.Linear's U(-1/sqrt(fan_in), 1/sqrt(fan_in))."""
    k1, k2, k3, k4 = jax.random.split(key, 4)
    bound1 = 1.0 / jnp.sqrt(input_dim)
    bound2 = 1.0 / jnp.sqrt(hidden_size)
    w1 = jax.random.uniform(k1, (input_dim, hidden_size), jnp.float32, -bound1, bound1)
    b1 = jax.random.uniform(k2, (hidden_size,), jnp.float32, -bound1, bound1)
    w2 = jax.random.uniform(k3, (hidden_size, 1), jnp.float32, -bound2, bound2)
    b2 = jax.random.uniform(k4, (1,), jnp.float32, -bound2, bound2)
    return w1, b1, w2, b2


if __name__ == "__main__":
    key = jax.random.PRNGKey(0)
    kx1, kx2, kp = jax.random.split(key, 3)

    # Small NCHW input consistent with Flatten -> Linear(input_dim = C*H*W)
    B, C, Hs, Ws = 2, 4, 16, 16
    input_dim = C * Hs * Ws          # 1024
    hidden_size = 128

    w1, b1, w2, b2 = init_params(kp, input_dim, hidden_size)

    def reference(xv):
        # Pure-JAX f32 reference of the PyTorch module.
        xf = xv.reshape(xv.shape[0], -1).astype(jnp.float32)
        h = jnp.maximum(jnp.dot(xf, w1) + b1, 0.0)
        return (jnp.dot(h, w2) + b2)[:, 0]

    # Tolerance covers MXU-vs-XLA default f32 matmul precision differences.
    tol = dict(atol=1e-2, rtol=1e-2)

    # 1) Demo shapes: single batch tile, whole-K kernel.
    x = jax.random.normal(kx1, (B, C, Hs, Ws), dtype=jnp.float32)
    out = jax.block_until_ready(value_network_forward(x, w1, b1, w2, b2))
    assert out.shape == (B,)
    assert jnp.allclose(out, reference(x), **tol), (out, reference(x))

    # 2) Ragged multi-tile batch (B=20 -> two batch tiles, partial last tile), whole-K kernel.
    x2 = jax.random.normal(kx2, (20, C, Hs, Ws), dtype=jnp.float32)
    out2 = jax.block_until_ready(value_network_forward(x2, w1, b1, w2, b2))
    assert out2.shape == (20,)
    assert jnp.allclose(out2, reference(x2), **tol), (out2, reference(x2))

    # 3) Same inputs through the K-tiled path (forced small K tile; 1024 % 384 != 0 exercises
    #    the ragged-K masking and the scratch accumulator init/finalize).
    out3 = jax.block_until_ready(value_network_forward(x2, w1, b1, w2, b2, k_tile=384))
    assert out3.shape == (20,)
    assert jnp.allclose(out3, reference(x2), **tol), (out3, reference(x2))

    print("KERNEL_OK")
</pallas_src>

<mosaic_0001>
module attributes {stable_mosaic.version = 11 : i64} {
  func.func @value_network_kernel(%arg0: i32, %arg1: memref<2x1024xf32, #tpu.memory_space<vmem>>, %arg2: memref<1024x128xf32, #tpu.memory_space<vmem>>, %arg3: memref<1x128xf32, #tpu.memory_space<vmem>>, %arg4: memref<1x128xf32, #tpu.memory_space<vmem>>, %arg5: memref<1xf32, #tpu.memory_space<smem>>, %arg6: memref<2x1xf32, #tpu.memory_space<vmem>>) attributes {dimension_semantics = [#tpu.dimension_semantics<parallel>], iteration_bounds = array<i64: 1>, scalar_prefetch = 0 : i64, scratch_operands = 0 : i64, tpu.core_type = #tpu.core_type<tc>, window_params = [{transform_indices = @transform_0, window_bounds = array<i64: 2, 1024>}, {pipeline_mode = #tpu.pipeline_mode<synchronous>, transform_indices = @transform_1, window_bounds = array<i64: 1024, 128>}, {pipeline_mode = #tpu.pipeline_mode<synchronous>, transform_indices = @transform_2, window_bounds = array<i64: 1, 128>}, {pipeline_mode = #tpu.pipeline_mode<synchronous>, transform_indices = @transform_3, window_bounds = array<i64: 1, 128>}, {transform_indices = @transform_4, window_bounds = array<i64: 1>}, {transform_indices = @transform_5, window_bounds = array<i64: 2, 1>}]} {
    %c0 = arith.constant 0 : index
    %c0_0 = arith.constant 0 : index
    %0 = vector.load %arg1[%c0, %c0_0] : memref<2x1024xf32, #tpu.memory_space<vmem>>, vector<2x1024xf32>
    %c0_1 = arith.constant 0 : index
    %c0_2 = arith.constant 0 : index
    %1 = vector.load %arg2[%c0_1, %c0_2] : memref<1024x128xf32, #tpu.memory_space<vmem>>, vector<1024x128xf32>
    %cst = arith.constant dense<0.000000e+00> : vector<2x128xf32>
    %2 = tpu.matmul %0, %1, %cst {dimension_numbers = #tpu.dot_dimension_numbers<[1], [0], [0], [1], [0, 0, 1, 1], [], []>} : vector<2x1024xf32>, vector<1024x128xf32>, vector<2x128xf32> -> vector<2x128xf32>
    %c0_3 = arith.constant 0 : index
    %c0_4 = arith.constant 0 : index
    %3 = vector.load %arg3[%c0_3, %c0_4] : memref<1x128xf32, #tpu.memory_space<vmem>>, vector<1x128xf32>
    %4 = vector.broadcast %3 : vector<1x128xf32> to vector<2x128xf32>
    %5 = arith.addf %2, %4 : vector<2x128xf32>
    %cst_5 = arith.constant 0.000000e+00 : f32
    %6 = vector.broadcast %cst_5 : f32 to vector<2x128xf32>
    %7 = arith.maximumf %5, %6 : vector<2x128xf32>
    %c0_6 = arith.constant 0 : index
    %c0_7 = arith.constant 0 : index
    %8 = vector.load %arg4[%c0_6, %c0_7] : memref<1x128xf32, #tpu.memory_space<vmem>>, vector<1x128xf32>
    %9 = vector.broadcast %8 : vector<1x128xf32> to vector<2x128xf32>
    %10 = arith.mulf %7, %9 : vector<2x128xf32>
    %cst_8 = arith.constant dense<0.000000e+00> : vector<2xf32>
    %11 = vector.multi_reduction <add>, %10, %cst_8 [1] : vector<2x128xf32> to vector<2xf32>
    %12 = vector.shape_cast %11 : vector<2xf32> to vector<2x1xf32>
    %c0_9 = arith.constant 0 : index
    %13 = memref.load %arg5[%c0_9] : memref<1xf32, #tpu.memory_space<smem>>
    %14 = vector.broadcast %13 : f32 to vector<2x1xf32>
    %15 = arith.addf %12, %14 : vector<2x1xf32>
    %c0_10 = arith.constant 0 : index
    %c0_11 = arith.constant 0 : index
    %16 = vector.load %arg6[%c0_10, %c0_11] : memref<2x1xf32, #tpu.memory_space<vmem>>, vector<2x1xf32>
    tpu.vector_store %arg6[%c0_10, %c0_11], %15 {strides = array<i32>} : memref<2x1xf32, #tpu.memory_space<vmem>>, vector<2x1xf32>,
    return
  }
  func.func @transform_0(%arg0: i32) -> (i32, i32) {
    %c0_i32 = arith.constant 0 : i32
    %c0_i32_0 = arith.constant 0 : i32
    return %arg0, %c0_i32 : i32, i32
  }
  func.func @transform_1(%arg0: i32) -> (i32, i32) {
    %c0_i32 = arith.constant 0 : i32
    %c0_i32_0 = arith.constant 0 : i32
    %c0_i32_1 = arith.constant 0 : i32
    return %c0_i32, %c0_i32_0 : i32, i32
  }
  func.func @transform_2(%arg0: i32) -> (i32, i32) {
    %c0_i32 = arith.constant 0 : i32
    %c0_i32_0 = arith.constant 0 : i32
    %c0_i32_1 = arith.constant 0 : i32
    return %c0_i32, %c0_i32_0 : i32, i32
  }
  func.func @transform_3(%arg0: i32) -> (i32, i32) {
    %c0_i32 = arith.constant 0 : i32
    %c0_i32_0 = arith.constant 0 : i32
    %c0_i32_1 = arith.constant 0 : i32
    return %c0_i32, %c0_i32_0 : i32, i32
  }
  func.func @transform_4(%arg0: i32) -> i32 {
    %c0_i32 = arith.constant 0 : i32
    %c0_i32_0 = arith.constant 0 : i32
    return %c0_i32 : i32
  }
  func.func @transform_5(%arg0: i32) -> (i32, i32) {
    %c0_i32 = arith.constant 0 : i32
    %c0_i32_0 = arith.constant 0 : i32
    return %arg0, %c0_i32 : i32, i32
  }
}

</mosaic_0001>

<bundles_post_ra>
// kernel: tpu_custom_call.1
= control target key start
LH: loop header
LB: loop body
LE: loop exit
PB: predicated region body
PF: predicated region fallthrough
CT: control target
= control target key end

     0   :  { %11 = vsyncpa [#allocation4], 0  ;;  %s497_s0 = inlined_call_operand.hbm [shape: f32[2,1024], index: 0, kind: input, shape index: {}]   ;;  %s498_s1 = inlined_call_operand.hbm [shape: f32[1024,128], index: 1, kind: input, shape index: {}]   ;;  %s499_s2 = inlined_call_operand.vmem [shape: f32[1,128], index: 2, kind: input, shape index: {}]   ;;  %s500_s3 = inlined_call_operand.vmem [shape: f32[1,128], index: 3, kind: input, shape index: {}]   ;;  %s501_s4 = inlined_call_operand.<no memory space> [shape: f32[1], index: 4, kind: input, shape index: {}]   ;;  %s502_s5 = inlined_call_operand.vmem [shape: f32[2,1], index: 5, kind: output, shape index: {}]  }
   0x1   :  { %s18_s20 = sshll.u32 %s497_s0, 4  ;;  %s19_s20 = int_to_ptr.hbm [resolvable:$true] %s18_s20 }
   0x2   :  { %12 = vsyncpa [#allocation6], 0  ;;  %s445_s21 = smov [#allocation3]   ;;  %s28_s25 = sshll.u32 %s498_s1, 4  ;;  %s29_s25 = int_to_ptr.hbm [resolvable:$true] %s28_s25 }
   0x3   :  { %s20_s22 = sshll.u32 %s445_s21, 4  ;;  %s446_s26 = smov [#allocation5]   ;;  %s21_s22 = int_to_ptr.vmem [resolvable:$true] %s20_s22 }
   0x4   :  { %23 = dma.hbm_to_vmem [thread:$0]  %s19_s20, 256, %s21_s22, [#allocation4]  }
   0x5   :  { %s30_s27 = sshll.u32 %s446_s26, 4  ;;  %s447_s28 = smov 128   ;;  %s31_s27 = int_to_ptr.vmem [resolvable:$true] %s30_s27 }
   0x6   :  { %s448_s29 = smov 8  }
   0x7   :  { %36 = dma.hbm_to_vmem [thread:$0]  %s29_s25, 16384, %s31_s27, [#allocation6], %s447_s28, %s447_s28, %s448_s29  }
   0x8   :  { %441 = dma.done.wait [#allocation4], 256  }
   0x9   :  { %442 = vsyncadd [#allocation4], 4294967040 }
   0xa   :  { %443 = dma.done.wait [#allocation6], 16384  }
   0xb   :  { %444 = vsyncadd [#allocation6], 4294950912  ;;  %v100_v0 = vld [vmem:[#allocation5 + $0x178] sm:$0xff]  ;;  %v99_v2 = vld [vmem:[#allocation5 + $0x170] sm:$0xff]  ;;  %vm372_vm0 = vcmask 1041408   ;;  %vm379_vm1 = vcmask 1024  }
   0xc   :  { %v68_v1 = vld [vmem:[#allocation5 + $0x78] sm:$0xff]  ;;  %246 = vmatpush.msra.mxu2 %v100_v0  ;;  %v67_v4 = vld [vmem:[#allocation5 + $0x70] sm:$0xff]  ;;  %v98_v6 = vld [vmem:[#allocation5 + $0x168] sm:$0xff] }
   0xd   :  { %206 = vmatpush.msra.mxu0 %v68_v1  ;;  %v116_v3 = vld [vmem:[#allocation5 + $0x1f8] sm:$0xff]  ;;  %v115_v7 = vld [vmem:[#allocation5 + $0x1f0] sm:$0xff]  ;;  %v66_v8 = vld [vmem:[#allocation5 + $0x68] sm:$0xff] }
   0xe   :  { %v84_v5 = vld [vmem:[#allocation5 + $0xf8] sm:$0xff]  ;;  %266 = vmatpush.msra.mxu3 %v116_v3  ;;  %247 = vmatpush.msra.mxu2 %v99_v2  ;;  %v83_v9 = vld [vmem:[#allocation5 + $0xf0] sm:$0xff]  ;;  %v114_v10 = vld [vmem:[#allocation5 + $0x1e8] sm:$0xff] }
   0xf   :  { %226 = vmatpush.msra.mxu1 %v84_v5  ;;  %207 = vmatpush.msra.mxu0 %v67_v4  ;;  %v97_v11 = vld [vmem:[#allocation5 + $0x160] sm:$0xff]  ;;  %v82_v13 = vld [vmem:[#allocation5 + $0xe8] sm:$0xff]  ;;  %v96_v16 = vld [vmem:[#allocation5 + $0x158] sm:$0xff] }
  0x10   :  { %267 = vmatpush.msra.mxu3 %v115_v7  ;;  %v65_v12 = vld [vmem:[#allocation5 + $0x60] sm:$0xff]  ;;  %248 = vmatpush.msra.mxu2 %v98_v6  ;;  %v64_v17 = vld [vmem:[#allocation5 + $0x58] sm:$0xff]  ;;  %v95_v20 = vld [vmem:[#allocation5 + $0x150] sm:$0xff] }
  0x11   :  { %227 = vmatpush.msra.mxu1 %v83_v9  ;;  %208 = vmatpush.msra.mxu0 %v66_v8  ;;  %v113_v14 = vld [vmem:[#allocation5 + $0x1e0] sm:$0xff]  ;;  %v112_v18 = vld [vmem:[#allocation5 + $0x1d8] sm:$0xff]  ;;  %v63_v21 = vld [vmem:[#allocation5 + $0x50] sm:$0xff] }
  0x12   :  { %v81_v15 = vld [vmem:[#allocation5 + $0xe0] sm:$0xff]  ;;  %268 = vmatpush.msra.mxu3 %v114_v10  ;;  %249 = vmatpush.msra.mxu2 %v97_v11  ;;  %v80_v19 = vld [vmem:[#allocation5 + $0xd8] sm:$0xff]  ;;  %v111_v22 = vld [vmem:[#allocation5 + $0x1d0] sm:$0xff] }
  0x13   :  { %228 = vmatpush.msra.mxu1 %v82_v13  ;;  %209 = vmatpush.msra.mxu0 %v65_v12  ;;  %v79_v23 = vld [vmem:[#allocation5 + $0xd0] sm:$0xff]  ;;  %v94_v24 = vld [vmem:[#allocation5 + $0x148] sm:$0xff]  ;;  %v93_v28 = vld [vmem:[#allocation5 + $0x140] sm:$0xff] }
  0x14   :  { %269 = vmatpush.msra.mxu3 %v113_v14  ;;  %250 = vmatpush.msra.mxu2 %v96_v16  ;;  %v62_v25 = vld [vmem:[#allocation5 + $0x48] sm:$0xff]  ;;  %v61_v29 = vld [vmem:[#allocation5 + $0x40] sm:$0xff]  ;;  %v92_v32 = vld [vmem:[#allocation5 + $0x138] sm:$0xff] }
  0x15   :  { %229 = vmatpush.msra.mxu1 %v81_v15  ;;  %210 = vmatpush.msra.mxu0 %v64_v17  ;;  %v110_v26 = vld [vmem:[#allocation5 + $0x1c8] sm:$0xff]  ;;  %v109_v30 = vld [vmem:[#allocation5 + $0x1c0] sm:$0xff]  ;;  %v60_v33 = vld [vmem:[#allocation5 + $0x38] sm:$0xff] }
  0x16   :  { %270 = vmatpush.msra.mxu3 %v112_v18  ;;  %251 = vmatpush.msra.mxu2 %v95_v20  ;;  %v78_v27 = vld [vmem:[#allocation5 + $0xc8] sm:$0xff]  ;;  %v77_v31 = vld [vmem:[#allocation5 + $0xc0] sm:$0xff]  ;;  %v108_v34 = vld [vmem:[#allocation5 + $0x1b8] sm:$0xff] }
  0x17   :  { %230 = vmatpush.msra.mxu1 %v80_v19  ;;  %211 = vmatpush.msra.mxu0 %v63_v21  ;;  %v76_v35 = vld [vmem:[#allocation5 + $0xb8] sm:$0xff]  ;;  %v91_v36 = vld [vmem:[#allocation5 + $0x130] sm:$0xff]  ;;  %v90_v40 = vld [vmem:[#allocation5 + $0x128] sm:$0xff] }
  0x18   :  { %271 = vmatpush.msra.mxu3 %v111_v22  ;;  %252 = vmatpush.msra.mxu2 %v94_v24  ;;  %v59_v37 = vld [vmem:[#allocation5 + $0x30] sm:$0xff]  ;;  %v58_v41 = vld [vmem:[#allocation5 + $0x28] sm:$0xff]  ;;  %v89_v44 = vld [vmem:[#allocation5 + $0x120] sm:$0xff] }
  0x19   :  { %231 = vmatpush.msra.mxu1 %v79_v23  ;;  %212 = vmatpush.msra.mxu0 %v62_v25  ;;  %v107_v38 = vld [vmem:[#allocation5 + $0x1b0] sm:$0xff]  ;;  %v106_v42 = vld [vmem:[#allocation5 + $0x1a8] sm:$0xff]  ;;  %v57_v45 = vld [vmem:[#allocation5 + $0x20] sm:$0xff] }
  0x1a   :  { %272 = vmatpush.msra.mxu3 %v110_v26  ;;  %253 = vmatpush.msra.mxu2 %v93_v28  ;;  %v75_v39 = vld [vmem:[#allocation5 + $0xb0] sm:$0xff]  ;;  %v74_v43 = vld [vmem:[#allocation5 + $0xa8] sm:$0xff]  ;;  %v105_v46 = vld [vmem:[#allocation5 + $0x1a0] sm:$0xff] }
  0x1b   :  { %232 = vmatpush.msra.mxu1 %v78_v27  ;;  %213 = vmatpush.msra.mxu0 %v61_v29  ;;  %v73_v47 = vld [vmem:[#allocation5 + $0xa0] sm:$0xff]  ;;  %v88_v48 = vld [vmem:[#allocation5 + $0x118] sm:$0xff]  ;;  %v87_v52 = vld [vmem:[#allocation5 + $0x110] sm:$0xff] }
  0x1c   :  { %273 = vmatpush.msra.mxu3 %v109_v30  ;;  %254 = vmatpush.msra.mxu2 %v92_v32  ;;  %v56_v49 = vld [vmem:[#allocation5 + $0x18] sm:$0xff]  ;;  %v55_v53 = vld [vmem:[#allocation5 + $0x10] sm:$0xff]  ;;  %v86_v56 = vld [vmem:[#allocation5 + $0x108] sm:$0xff] }
  0x1d   :  { %233 = vmatpush.msra.mxu1 %v77_v31  ;;  %214 = vmatpush.msra.mxu0 %v60_v33  ;;  %v104_v50 = vld [vmem:[#allocation5 + $0x198] sm:$0xff]  ;;  %v103_v54 = vld [vmem:[#allocation5 + $0x190] sm:$0xff]  ;;  %v54_v57 = vld [vmem:[#allocation5 + $0x8] sm:$0xff] }
  0x1e   :  { %274 = vmatpush.msra.mxu3 %v108_v34  ;;  %255 = vmatpush.msra.mxu2 %v91_v36  ;;  %v72_v51 = vld [vmem:[#allocation5 + $0x98] sm:$0xff]  ;;  %v71_v55 = vld [vmem:[#allocation5 + $0x90] sm:$0xff]  ;;  %v102_v58 = vld [vmem:[#allocation5 + $0x188] sm:$0xff] }
  0x1f   :  { %234 = vmatpush.msra.mxu1 %v76_v35  ;;  %215 = vmatpush.msra.mxu0 %v59_v37  ;;  %v70_v59 = vld [vmem:[#allocation5 + $0x88] sm:$0xff]  ;;  %v85_v60 = vld [vmem:[#allocation5 + $0x100] sm:$0xff]  ;;  %v164_v62 = vld [vmem:[#allocation5 + $0x378] sm:$0xff] }
  0x20   :  { %275 = vmatpush.msra.mxu3 %v107_v38  ;;  %256 = vmatpush.msra.mxu2 %v90_v40  ;;  %v53_v61 = vld [vmem:[#allocation5] sm:$0xff]  ;;  %v132_v0 = vld [vmem:[#allocation5 + $0x278] sm:$0xff]  ;;  %v163_v2 = vld [vmem:[#allocation5 + $0x370] sm:$0xff] }
  0x21   :  { %235 = vmatpush.msra.mxu1 %v75_v39  ;;  %216 = vmatpush.msra.mxu0 %v58_v41  ;;  %v101_v63 = vld [vmem:[#allocation5 + $0x180] sm:$0xff]  ;;  %v180_v1 = vld [vmem:[#allocation5 + $0x3f8] sm:$0xff]  ;;  %v131_v4 = vld [vmem:[#allocation5 + $0x270] sm:$0xff] }
  0x22   :  { %276 = vmatpush.msra.mxu3 %v106_v42  ;;  %257 = vmatpush.msra.mxu2 %v89_v44  ;;  %v69_v3 = vld [vmem:[#allocation5 + $0x80] sm:$0xff]  ;;  %v148_v5 = vld [vmem:[#allocation5 + $0x2f8] sm:$0xff]  ;;  %v162_v6 = vld [vmem:[#allocation5 + $0x368] sm:$0xff] }
  0x23   :  { %236 = vmatpush.msra.mxu1 %v74_v43  ;;  %217 = vmatpush.msra.mxu0 %v57_v45  ;;  %v179_v7 = vld [vmem:[#allocation5 + $0x3f0] sm:$0xff]  ;;  %v130_v8 = vld [vmem:[#allocation5 + $0x268] sm:$0xff]  ;;  %v161_v10 = vld [vmem:[#allocation5 + $0x360] sm:$0xff] }
  0x24   :  { %277 = vmatpush.msra.mxu3 %v105_v46  ;;  %258 = vmatpush.msra.mxu2 %v88_v48  ;;  %v147_v9 = vld [vmem:[#allocation5 + $0x2f0] sm:$0xff]  ;;  %v178_v11 = vld [vmem:[#allocation5 + $0x3e8] sm:$0xff]  ;;  %v129_v12 = vld [vmem:[#allocation5 + $0x260] sm:$0xff] }
  0x25   :  { %237 = vmatpush.msra.mxu1 %v73_v47  ;;  %218 = vmatpush.msra.mxu0 %v56_v49  ;;  %v146_v13 = vld [vmem:[#allocation5 + $0x2e8] sm:$0xff]  ;;  %v51_v14 = vld [vmem:[#allocation3] sm:$0xff]  ;;  %v160_v15 = vld [vmem:[#allocation5 + $0x358] sm:$0xff] }
  0x26   :  { %278 = vmatpush.msra.mxu3 %v104_v50  ;;  %259 = vmatpush.msra.mxu2 %v87_v52  ;;  %v177_v16 = vld [vmem:[#allocation5 + $0x3e0] sm:$0xff]  ;;  %187 = vst [vmem:[#allocation1] ss:$4 sm:$0xff] %v51_v14  ;;  %v128_v17 = vld [vmem:[#allocation5 + $0x258] sm:$0xff]  ;;  %v159_v19 = vld [vmem:[#allocation5 + $0x350] sm:$0xff] }
  0x27   :  { %238 = vmatpush.msra.mxu1 %v72_v51  ;;  %219 = vmatpush.msra.mxu0 %v55_v53  ;;  %v145_v18 = vld [vmem:[#allocation5 + $0x2e0] sm:$0xff]  ;;  %v176_v20 = vld [vmem:[#allocation5 + $0x3d8] sm:$0xff]  ;;  %v127_v21 = vld [vmem:[#allocation5 + $0x250] sm:$0xff] }
  0x28   :  { %279 = vmatpush.msra.mxu3 %v103_v54  ;;  %260 = vmatpush.msra.mxu2 %v86_v56  ;;  %v144_v22 = vld [vmem:[#allocation5 + $0x2d8] sm:$0xff]  ;;  %v158_v23 = vld [vmem:[#allocation5 + $0x348] sm:$0xff]  ;;  %v175_v24 = vld [vmem:[#allocation5 + $0x3d0] sm:$0xff] }
  0x29   :  { %239 = vmatpush.msra.mxu1 %v71_v55  ;;  %220 = vmatpush.msra.mxu0 %v54_v57  ;;  %v52_v25 = vld [vmem:[#allocation3 + $0x8] sm:$0xff]  ;;  %v126_v26 = vld [vmem:[#allocation5 + $0x248] sm:$0xff]  ;;  %v143_v27 = vld [vmem:[#allocation5 + $0x2d0] sm:$0xff] }
  0x2a   :  { %280 = vmatpush.msra.mxu3 %v102_v58  ;;  %261 = vmatpush.msra.mxu2 %v85_v60  ;;  %189 = vst [vmem:[#allocation1 + $0x20] ss:$4 sm:$0xff] %v52_v25  ;;  %v157_v28 = vld [vmem:[#allocation5 + $0x340] sm:$0xff]  ;;  %v174_v29 = vld [vmem:[#allocation5 + $0x3c8] sm:$0xff]  ;;  %v156_v32 = vld [vmem:[#allocation5 + $0x338] sm:$0xff] }
  0x2b   :  { %240 = vmatpush.msra.mxu1 %v70_v59  ;;  %221 = vmatpush.msra.mxu0 %v53_v61  ;;  %v125_v30 = vld [vmem:[#allocation5 + $0x240] sm:$0xff]  ;;  %v142_v31 = vld [vmem:[#allocation5 + $0x2c8] sm:$0xff]  ;;  %v124_v34 = vld [vmem:[#allocation5 + $0x238] sm:$0xff] }
  0x2c   :  { %326 = vmatpush.msrb.mxu2 %v164_v62  ;;  %281 = vmatpush.msra.mxu3 %v101_v63  ;;  %v173_v33 = vld [vmem:[#allocation5 + $0x3c0] sm:$0xff]  ;;  %v155_v36 = vld [vmem:[#allocation5 + $0x330] sm:$0xff]  ;;  %v172_v37 = vld [vmem:[#allocation5 + $0x3b8] sm:$0xff] }
  0x2d   :  { %286 = vmatpush.msrb.mxu0 %v132_v0  ;;  %241 = vmatpush.msra.mxu1 %v69_v3  ;;  %v141_v35 = vld [vmem:[#allocation5 + $0x2c0] sm:$0xff]  ;;  %v123_v38 = vld [vmem:[#allocation5 + $0x230] sm:$0xff]  ;;  %v140_v39 = vld [vmem:[#allocation5 + $0x2b8] sm:$0xff] }
  0x2e   :  { %346 = vmatpush.msrb.mxu3 %v180_v1  ;;  %327 = vmatpush.msrb.mxu2 %v163_v2  ;;  %v154_v40 = vld [vmem:[#allocation5 + $0x328] sm:$0xff]  ;;  %v171_v41 = vld [vmem:[#allocation5 + $0x3b0] sm:$0xff]  ;;  %v153_v44 = vld [vmem:[#allocation5 + $0x320] sm:$0xff] }
  0x2f   :  { %287 = vmatpush.msrb.mxu0 %v131_v4  ;;  %306 = vmatpush.msrb.mxu1 %v148_v5  ;;  %v122_v42 = vld [vmem:[#allocation5 + $0x228] sm:$0xff]  ;;  %v139_v43 = vld [vmem:[#allocation5 + $0x2b0] sm:$0xff]  ;;  %v192_v46 = vld.sshfl [vmem:[#allocation1 + $0x10] sm:$0xff pattern:$0x73625140] }
  0x30   :  { %328 = vmatpush.msrb.mxu2 %v162_v6  ;;  %347 = vmatpush.msrb.mxu3 %v179_v7  ;;  %v170_v45 = vld [vmem:[#allocation5 + $0x3a8] sm:$0xff]  ;;  %v121_v47 = vld [vmem:[#allocation5 + $0x220] sm:$0xff]  ;;  %v152_v49 = vld [vmem:[#allocation5 + $0x318] sm:$0xff] }
  0x31   :  { %288 = vmatpush.msrb.mxu0 %v130_v8  ;;  %307 = vmatpush.msrb.mxu1 %v147_v9  ;;  %v138_v48 = vld [vmem:[#allocation5 + $0x2a8] sm:$0xff]  ;;  %v169_v50 = vld [vmem:[#allocation5 + $0x3a0] sm:$0xff]  ;;  %v120_v53 = vld [vmem:[#allocation5 + $0x218] sm:$0xff] }
  0x32   :  { %329 = vmatpush.msrb.mxu2 %v161_v10  ;;  %348 = vmatpush.msrb.mxu3 %v178_v11  ;;  %v190_v51 = vld.sshfl [vmem:[#allocation1] sm:$0xff pattern:$0x73625140]  ;;  %v193_v52 = vld.sshfl [vmem:[#allocation1 + $0x18] sm:$0xff pattern:$0x73625140] }
  0x33   :  { %289 = vmatpush.msrb.mxu0 %v129_v12  ;;  %308 = vmatpush.msrb.mxu1 %v146_v13  ;;  %v137_v54 = vld [vmem:[#allocation5 + $0x2a0] sm:$0xff]  ;;  %v151_v55 = vld [vmem:[#allocation5 + $0x310] sm:$0xff]  ;;  %v168_v56 = vld [vmem:[#allocation5 + $0x398] sm:$0xff] }
  0x34   :  { %330 = vmatpush.msrb.mxu2 %v160_v15  ;;  %349 = vmatpush.msrb.mxu3 %v177_v16  ;;  %v191_v57 = vld.sshfl [vmem:[#allocation1 + $0x8] sm:$0xff pattern:$0x73625140]  ;;  %v136_v59 = vld [vmem:[#allocation5 + $0x298] sm:$0xff]  ;;  %v150_v60 = vld [vmem:[#allocation5 + $0x308] sm:$0xff] }
  0x35   :  { %290 = vmatpush.msrb.mxu0 %v128_v17  ;;  %309 = vmatpush.msrb.mxu1 %v145_v18  ;;  %v119_v58 = vld [vmem:[#allocation5 + $0x210] sm:$0xff]  ;;  %v118_v62 = vld [vmem:[#allocation5 + $0x208] sm:$0xff]  ;;  %v149_v0 = vld [vmem:[#allocation5 + $0x300] sm:$0xff] }
  0x36   :  { %331 = vmatpush.msrb.mxu2 %v159_v19  ;;  %350 = vmatpush.msrb.mxu3 %v176_v20  ;;  %v167_v61 = vld [vmem:[#allocation5 + $0x390] sm:$0xff]  ;;  %v166_v1 = vld [vmem:[#allocation5 + $0x388] sm:$0xff]  ;;  %v196_v2 = vld.sshfl [vmem:[#allocation1 + $0x30] sm:$0xff pattern:$0x73625140] }
  0x37   :  { %291 = vmatpush.msrb.mxu0 %v127_v21  ;;  %310 = vmatpush.msrb.mxu1 %v144_v22  ;;  %v135_v63 = vld [vmem:[#allocation5 + $0x290] sm:$0xff]  ;;  %v117_v3 = vld [vmem:[#allocation5 + $0x200] sm:$0xff]  ;;  %v134_v4 = vld [vmem:[#allocation5 + $0x288] sm:$0xff] }
  0x38   :  { %332 = vmatpush.msrb.mxu2 %v158_v23  ;;  %351 = vmatpush.msrb.mxu3 %v175_v24  ;;  %v165_v5 = vld [vmem:[#allocation5 + $0x380] sm:$0xff]  ;;  %v194_v6 = vld.sshfl [vmem:[#allocation1 + $0x20] sm:$0xff pattern:$0x73625140] }
  0x39   :  { %292 = vmatpush.msrb.mxu0 %v126_v26  ;;  %311 = vmatpush.msrb.mxu1 %v143_v27  ;;  %v197_v7 = vld.sshfl [vmem:[#allocation1 + $0x38] sm:$0xff pattern:$0x73625140]  ;;  %v195_v9 = vld.sshfl [vmem:[#allocation1 + $0x28] sm:$0xff pattern:$0x73625140] }
  0x3a   :  { %333 = vmatpush.msrb.mxu2 %v157_v28  ;;  %352 = vmatpush.msrb.mxu3 %v174_v29  ;;  %v133_v8 = vld [vmem:[#allocation5 + $0x280] sm:$0xff]  ;;  %v391_v10 = vld [vmem:[%s499_s2] ss:$0 sm:$0xff] }
  0x3b   :  { %293 = vmatpush.msrb.mxu0 %v125_v30  ;;  %312 = vmatpush.msrb.mxu1 %v142_v31  ;;  %v392_v27 = vld [vmem:[%s500_s3] ss:$0 sm:$0xff]  ;;  %v377_v31 = vstv %s501_s4 }
  0x3c   :  { %334 = vmatpush.msrb.mxu2 %v156_v32  ;;  %353 = vmatpush.msrb.mxu3 %v173_v33 }
  0x3d   :  { %294 = vmatpush.msrb.mxu0 %v124_v34  ;;  %313 = vmatpush.msrb.mxu1 %v141_v35 }
  0x3e   :  { %335 = vmatpush.msrb.mxu2 %v155_v36  ;;  %354 = vmatpush.msrb.mxu3 %v172_v37 }
  0x3f   :  { %295 = vmatpush.msrb.mxu0 %v123_v38  ;;  %314 = vmatpush.msrb.mxu1 %v140_v39 }
  0x40   :  { %336 = vmatpush.msrb.mxu2 %v154_v40  ;;  %355 = vmatpush.msrb.mxu3 %v171_v41 }
  0x41   :  { %296 = vmatpush.msrb.mxu0 %v122_v42  ;;  %315 = vmatpush.msrb.mxu1 %v139_v43 }
  0x42   :  { %337 = vmatpush.msrb.mxu2 %v153_v44  ;;  %356 = vmatpush.msrb.mxu3 %v170_v45 }
  0x43   :  { %262 = vmatmul.f32.vlgmr.msra.gmra.mxu2 %v192_v46  ;;  %297 = vmatpush.msrb.mxu0 %v121_v47 }
  0x44   :  { %316 = vmatpush.msrb.mxu1 %v138_v48  ;;  %338 = vmatpush.msrb.mxu2 %v152_v49 }
  0x45   :  { %357 = vmatpush.msrb.mxu3 %v169_v50  ;;  %222 = vmatmul.f32.vlgmr.msra.gmra.mxu0 %v190_v51 }
  0x46   :  { %282 = vmatmul.f32.vlgmr.msra.gmra.mxu3 %v193_v52  ;;  %298 = vmatpush.msrb.mxu0 %v120_v53 }
  0x47   :  { %317 = vmatpush.msrb.mxu1 %v137_v54  ;;  %339 = vmatpush.msrb.mxu2 %v151_v55 }
  0x48   :  { %358 = vmatpush.msrb.mxu3 %v168_v56  ;;  %242 = vmatmul.f32.vlgmr.msra.gmra.mxu1 %v191_v57 }
  0x49   :  { %299 = vmatpush.msrb.mxu0 %v119_v58  ;;  %318 = vmatpush.msrb.mxu1 %v136_v59 }
  0x4a   :  { %340 = vmatpush.msrb.mxu2 %v150_v60  ;;  %359 = vmatpush.msrb.mxu3 %v167_v61 }
  0x4b   :  { %300 = vmatpush.msrb.mxu0 %v118_v62  ;;  %319 = vmatpush.msrb.mxu1 %v135_v63 }
  0x4c   :  { %341 = vmatpush.msrb.mxu2 %v149_v0  ;;  %360 = vmatpush.msrb.mxu3 %v166_v1 }
  0x4d   :  { %342 = vmatmul.f32.vlgmr.msrb.gmra.mxu2 %v196_v2  ;;  %301 = vmatpush.msrb.mxu0 %v117_v3 }
  0x4e   :  { %320 = vmatpush.msrb.mxu1 %v134_v4  ;;  %361 = vmatpush.msrb.mxu3 %v165_v5 }
  0x4f   :  { %302 = vmatmul.f32.vlgmr.msrb.gmra.mxu0 %v194_v6  ;;  %362 = vmatmul.f32.vlgmr.msrb.gmra.mxu3 %v197_v7 }
  0x50   :  { %321 = vmatpush.msrb.mxu1 %v133_v8 }
  0x51   :  { %322 = vmatmul.f32.vlgmr.msrb.gmra.mxu1 %v195_v9 }
  0xc2   :  { %v223_v11 = vpop.f32.mrf.mxu0 }
  0xc3   :  { %v224_v12 = vadd.f32 %v391_v10, %v223_v11 }
  0xc5   :  { %v243_v13 = vpop.f32.mrf.mxu1 }
  0xc6   :  { %v244_v14 = vadd.f32 %v243_v13, %v224_v12  ;;  %v263_v15 = vpop.f32.mrf.mxu2 }
  0xc8   :  { %v264_v16 = vadd.f32 %v263_v15, %v244_v14 }
  0xc9   :  { %v283_v17 = vpop.f32.mrf.mxu3 }
  0xca   :  { %v284_v18 = vadd.f32 %v283_v17, %v264_v16 }
  0xcc   :  { %v303_v19 = vpop.f32.mrf.mxu0 }
  0xcd   :  { %v304_v20 = vadd.f32 %v303_v19, %v284_v18 }
  0xce   :  { %v323_v21 = vpop.f32.mrf.mxu1 }
  0xcf   :  { %v324_v22 = vadd.f32 %v323_v21, %v304_v20 }
  0xd0   :  { %v343_v23 = vpop.f32.mrf.mxu2 }
  0xd1   :  { %v344_v24 = vadd.f32 %v343_v23, %v324_v22 }
  0xd2   :  { %v363_v25 = vpop.f32.mrf.mxu3 }
  0xd3   :  { %v364_v26 = vadd.f32 %v363_v25, %v344_v24 }
  0xd5   :  { %v366_v28 = vmax.f32 %v364_v26, 0.0 }
  0xd7   :  { %v371_v29 = vmul.f32 %v392_v27, %v366_v28 }
  0xd9   :  { %v373_v30 = vsel %vm372_vm0, %v371_v29, 0.0 }
  0xda   :  { %374 = vadd.xlane.f32.xlu0 %v373_v30 }
 0x14d   :  { %v375_v32 = vpop.xlane.xlu0 %374 }
 0x14e   :  { %v378_v33 = vadd.f32 %v377_v31, %v375_v32 }
 0x150   :  { %380 = vst.msk [vmem:[%s502_s5] sm:$0x3] %vm379_vm1, %v378_v33 }
 0x151   :  { %385 = vsyncpa [#allocation4], 1 }
 0x152   :  { %386 = vsyncpa [#allocation6], 1 }

</bundles_post_ra>
